<compile_context>
chip_gen: v7x
topology: tpu7x:2x2x1
jax: 0.10.0
libtpu: 0.0.40
codegen_flags: <defaults>
</compile_context>

<pallas_src>
import jax
import jax.numpy as jnp
from jax.experimental import pallas as pl
from jax.experimental.pallas import tpu as pltpu

LP_DTYPE = jnp.float8_e4m3fn   # lp_dtype of the quantized input
HP_DTYPE = jnp.bfloat16        # hp_dtype of the dequantized output


def _dequant_kernel(scale_ref, x_ref, o_ref):
    # scale_ref: (1,) f32 in SMEM (the module's scalar parameter)
    # x_ref:     (tm, L) fp8 tile in VMEM
    # o_ref:     (tm, L) hp-dtype tile in VMEM
    # One fused elementwise chain: load -> convert -> mul (f32) -> cast -> store.
    # f32 math => a single final rounding to hp_dtype (matches the torch ref).
    s = scale_ref[0]
    o_ref[...] = (x_ref[...].astype(jnp.float32) * s).astype(o_ref.dtype)


def _vmem_capacity_bytes():
    """Physical VMEM of the current chip; conservative 64 MiB fallback."""
    try:
        info = pltpu.get_tpu_info()
        cap = getattr(info, "vmem_capacity_bytes", None)
        if cap:
            return int(cap)
    except Exception:  # pragma: no cover - conservative fallback
        pass
    return 64 * 1024 * 1024


def _choose_lane_width(total, max_lanes=1024):
    """Widest power-of-two multiple of 128 (<= max_lanes) dividing `total`.

    Returns 0 when total is not divisible by 128 (ragged case)."""
    L = max_lanes
    while L > 128 and total % L:
        L //= 2
    return L if total % L == 0 else 0


def _choose_row_tile(M, L, lp_itemsize, hp_itemsize, vmem_bytes):
    """Row tile size.

    Keeps tm*L bytes ~constant (so per-step pipeline overhead stays amortized
    even when L shrinks) and caps tm so medium tensors still get >= ~4 grid
    steps for megacore sharding + double-buffered prefetch/writeback overlap.
    tm is a multiple of 32 (fp8 packs 4 rows per sublane) unless it equals M.
    """
    bytes_per_row = 2 * L * (lp_itemsize + hp_itemsize)   # double-buffered in+out
    if vmem_bytes <= 64 * 1024 * 1024:
        budget = 24 * 1024 * 1024      # v7x-class: stay well inside 64 MiB VMEM
    else:
        budget = 48 * 1024 * 1024      # v5e/v6e: 128 MiB VMEM -> bigger tiles free
    tm = max(32, (budget // bytes_per_row) // 32 * 32)
    if M > 128:
        cap = ((-(-M // 4) + 31) // 32) * 32               # ceil32(cdiv(M, 4))
        tm = min(tm, max(32, cap))
    if tm >= M:
        tm = M
    return int(tm)


def _dequant_2d(x2d, scale_arr, hp_dtype, tm):
    M, L = x2d.shape
    grid = (pl.cdiv(M, tm),)

    lp_isz = jnp.dtype(x2d.dtype).itemsize
    hp_isz = jnp.dtype(hp_dtype).itemsize
    footprint = 2 * tm * L * (lp_isz + hp_isz)             # double-buffered in+out
    vmem_limit = max(32 * 1024 * 1024, footprint + 8 * 1024 * 1024)

    return pl.pallas_call(
        _dequant_kernel,
        out_shape=jax.ShapeDtypeStruct((M, L), hp_dtype),
        grid=grid,
        in_specs=[
            pl.BlockSpec(memory_space=pltpu.SMEM),          # scalar scale
            pl.BlockSpec((tm, L), lambda i: (i, 0)),        # fp8 input tile
        ],
        out_specs=pl.BlockSpec((tm, L), lambda i: (i, 0)),
        compiler_params=pltpu.CompilerParams(
            dimension_semantics=("parallel",),              # megacore-shardable rows
            vmem_limit_bytes=int(vmem_limit),
        ),
        cost_estimate=pl.CostEstimate(
            flops=int(M) * int(L),
            transcendentals=0,
            bytes_accessed=int(M) * int(L) * (lp_isz + hp_isz) + 4,
        ),
    )(scale_arr, x2d)


def dequant_output(x, scale, hp_dtype=HP_DTYPE, *, max_lanes=1024):
    """DequantOutput.forward: x (fp8) -> x.astype(hp_dtype) * scale."""
    orig_shape = x.shape
    total = x.size
    scale_arr = jnp.asarray(scale, dtype=jnp.float32).reshape(1)

    if total == 0:
        return jnp.zeros(orig_shape, dtype=hp_dtype)

    vmem_bytes = _vmem_capacity_bytes()
    lp_isz = jnp.dtype(x.dtype).itemsize
    hp_isz = jnp.dtype(hp_dtype).itemsize

    x_flat = x.reshape(-1)                                  # contiguous: no HBM copy

    L = _choose_lane_width(total, max_lanes)
    if L:
        # Fast path (common case): zero extra copies, pure HBM-roofline stream.
        M = total // L
        tm = _choose_row_tile(M, L, lp_isz, hp_isz, vmem_bytes)
        out2d = _dequant_2d(x_flat.reshape(M, L), scale_arr, hp_dtype, tm)
        return out2d.reshape(orig_shape)

    # Ragged total (total % 128 != 0, rare): run the 128-aligned body through
    # the kernel and the <128-element tail through plain jnp, then join.  This
    # avoids the full-tensor jnp.pad (input) + output-slice copies.
    body = (total // 128) * 128
    tail_out = (x_flat[body:].astype(jnp.float32) * scale_arr[0]).astype(hp_dtype)
    if body == 0:
        return tail_out.reshape(orig_shape)
    Lb = _choose_lane_width(body, max_lanes)
    Mb = body // Lb
    tmb = _choose_row_tile(Mb, Lb, lp_isz, hp_isz, vmem_bytes)
    body_out = _dequant_2d(x_flat[:body].reshape(Mb, Lb), scale_arr, hp_dtype, tmb)
    out_flat = jnp.concatenate([body_out.reshape(-1), tail_out])
    return out_flat.reshape(orig_shape)


if __name__ == "__main__":
    scale = jnp.float32(0.125)   # deterministic module parameter (nn.Parameter(scale))

    def ref(x_fp8, s, hp_dtype):
        return (x_fp8.astype(jnp.float32) * jnp.float32(s)).astype(hp_dtype)

    # Case 1: small module-shaped activation (batch=2, seq=8, hidden=32).
    B, S, H = 2, 8, 32
    x_hp = jax.random.normal(jax.random.PRNGKey(0), (B, S, H), dtype=jnp.float32)
    x_fp8 = (x_hp / scale).astype(LP_DTYPE)
    y = jax.block_until_ready(dequant_output(x_fp8, scale, HP_DTYPE))
    y_ref = ref(x_fp8, scale, HP_DTYPE)
    assert y.shape == (B, S, H) and y.dtype == HP_DTYPE
    assert jnp.array_equal(y.astype(jnp.float32), y_ref.astype(jnp.float32))

    # Case 2: multi-step grid (exercises pipelining / megacore row sharding).
    x2 = (jax.random.normal(jax.random.PRNGKey(1), (4, 384, 640), jnp.float32)
          / scale).astype(LP_DTYPE)
    y2 = jax.block_until_ready(dequant_output(x2, scale, HP_DTYPE))
    assert jnp.array_equal(y2.astype(jnp.float32),
                           ref(x2, scale, HP_DTYPE).astype(jnp.float32))

    # Case 3: ragged element count (total % 128 != 0) -> body-kernel + jnp tail.
    x3 = (jax.random.normal(jax.random.PRNGKey(2), (2, 9, 50), jnp.float32)
          / scale).astype(LP_DTYPE)
    y3 = jax.block_until_ready(dequant_output(x3, scale, HP_DTYPE))
    assert jnp.array_equal(y3.astype(jnp.float32),
                           ref(x3, scale, HP_DTYPE).astype(jnp.float32))

    print("KERNEL_OK")
</pallas_src>

<mosaic_0001>
module attributes {stable_mosaic.version = 11 : i64} {
  func.func @_dequant_kernel(%arg0: i32, %arg1: memref<1xf32, #tpu.memory_space<smem>>, %arg2: memref<1x512xf8E4M3FN, #tpu.memory_space<vmem>>, %arg3: memref<1x512xbf16, #tpu.memory_space<vmem>>) attributes {dimension_semantics = [#tpu.dimension_semantics<parallel>], iteration_bounds = array<i64: 1>, scalar_prefetch = 0 : i64, scratch_operands = 0 : i64, tpu.core_type = #tpu.core_type<tc>, window_params = [{transform_indices = @transform_0, window_bounds = array<i64: 1>}, {transform_indices = @transform_1, window_bounds = array<i64: 1, 512>}, {transform_indices = @transform_2, window_bounds = array<i64: 1, 512>}]} {
    %c0 = arith.constant 0 : index
    %0 = memref.load %arg1[%c0] : memref<1xf32, #tpu.memory_space<smem>>
    %c0_0 = arith.constant 0 : index
    %c0_1 = arith.constant 0 : index
    %1 = vector.load %arg2[%c0_0, %c0_1] : memref<1x512xf8E4M3FN, #tpu.memory_space<vmem>>, vector<1x512xf8E4M3FN>
    %2 = arith.extf %1 : vector<1x512xf8E4M3FN> to vector<1x512xf32>
    %3 = vector.broadcast %0 : f32 to vector<1x512xf32>
    %4 = arith.mulf %2, %3 : vector<1x512xf32>
    %5 = arith.truncf %4 : vector<1x512xf32> to vector<1x512xbf16>
    %c0_2 = arith.constant 0 : index
    %c0_3 = arith.constant 0 : index
    %6 = vector.load %arg3[%c0_2, %c0_3] : memref<1x512xbf16, #tpu.memory_space<vmem>>, vector<1x512xbf16>
    tpu.vector_store %arg3[%c0_2, %c0_3], %5 {strides = array<i32>} : memref<1x512xbf16, #tpu.memory_space<vmem>>, vector<1x512xbf16>,
    return
  }
  func.func @transform_0(%arg0: i32) -> i32 {
    %c0_i32 = arith.constant 0 : i32
    %c0_i32_0 = arith.constant 0 : i32
    return %c0_i32 : i32
  }
  func.func @transform_1(%arg0: i32) -> (i32, i32) {
    %c0_i32 = arith.constant 0 : i32
    %c0_i32_0 = arith.constant 0 : i32
    return %arg0, %c0_i32 : i32, i32
  }
  func.func @transform_2(%arg0: i32) -> (i32, i32) {
    %c0_i32 = arith.constant 0 : i32
    %c0_i32_0 = arith.constant 0 : i32
    return %arg0, %c0_i32 : i32, i32
  }
}

</mosaic_0001>

<bundles_post_ra>
// kernel: tpu_custom_call.1
= control target key start
LH: loop header
LB: loop body
LE: loop exit
PB: predicated region body
PF: predicated region fallthrough
CT: control target
= control target key end

     0   :  { %8 = vsyncpa [#allocation4], 0  ;;  %s230_s0 = inlined_call_operand.<no memory space> [shape: f32[1], index: 0, kind: input, shape index: {}]   ;;  %s231_s1 = inlined_call_operand.hbm [shape: f8e4m3fn[1,512], index: 1, kind: input, shape index: {}]   ;;  %s232_s2 = inlined_call_operand.hbm [shape: bf16[1,512], index: 2, kind: output, shape index: {}]  }
   0x1   :  { %9 = vsyncpa [#allocation5], 0  ;;  %s173_s9 = smov [#allocation3]   ;;  %s125_s13 = scalar_lea.hbm %s231_s1, 64 }
   0x2   :  { %s18_s10 = sshll.u32 %s173_s9, 4  ;;  %p126_p0 = scmp.ne.s32.totalorder %s231_s1, %s125_s13  ;;  %s19_s10 = int_to_ptr.vmem [resolvable:$true] %s18_s10 }
   0x3   :  { %p129_p1 = scmp.lt.u32.totalorder %s125_s13, %s231_s1 }
   0x5   :  { %p131_p2 = pnand %p129_p1, %p126_p0 }
   0x7   :  { %134 = shalt.err (!%p131_p2)
}
   0x8   :  { %s135_s18 = scalar_lea.vmem %s19_s10, 64  ;;  %p140_p4 = scmp.lt.s32.totalorder %s19_s10, %s19_s10 }
   0x9   :  { %p136_p3 = scmp.ne.s32.totalorder %s19_s10, %s135_s18  ;;  %p141_p5 = scmp.lt.s32.totalorder %s135_s18, %s135_s18 }
   0xb   :  { %p142_p6 = por %p141_p5, %p140_p4 }
   0xd   :  { %p143_p7 = pnand %p142_p6, %p136_p3 }
   0xf   :  { %146 = shalt.err (!%p143_p7)
}
  0x10   :  { %21 = dma.hbm_to_vmem [thread:$0]  %s231_s1, 64, %s19_s10, [#allocation4]  }
  0x11   :  { %169 = dma.done.wait [#allocation4], 64  }
  0x12   :  { %170 = vsyncadd [#allocation4], 4294967232  ;;  %v34_v0 = vlaneseq  ;;  %v174_v1 = vmov 1966171168   ;;  %vm87_vm0 = vcmask 1040384   ;;  %vm90_vm2 = vcmask 1041409  }
  0x13   :  { %v65_v2 = vunpack.c.l.s4 %v174_v1  ;;  %vm88_vm1 = vsmask.f32 256  ;;  %vm91_vm3 = vsmask.f32 1280  ;;  %v26_v4 = vld [vmem:[#allocation3] sm:$0xf]  ;;  %v29_v5 = vstv %s230_s0 }
  0x14   :  { %v35_v3 = vshrl.u32 %v34_v0, 7  ;;  %vm206_vm4 = vmand %vm87_vm0, %vm88_vm1  ;;  %v27_v8 = vunpack.c.0.f8e4m3fn %v26_v4  ;;  %v28_v9 = vunpack.c.1.f8e4m3fn %v26_v4  ;;  %vm94_vm6 = vcmask 1042434   ;;  %s175_s0 = smov [#allocation6]   ;;  %v102_v25 = vld [vmem:[#allocation6] sm:$0xf] }
  0x15   :  { %v66_v6 = vunpack.c.0.s8 %v65_v2  ;;  %vm210_vm5 = vmand %vm90_vm2, %vm91_vm3  ;;  %vm95_vm7 = vsmask.f32 2304  ;;  %vm98_vm10 = vcmask 1043459   ;;  %vm99_vm11 = vsmask.f32 3328  ;;  %s111_s1 = sshll.u32 %s175_s0, 4  ;;  %s112_s1 = int_to_ptr.vmem [resolvable:$true] %s111_s1 }
  0x16   :  { %v36_v10 = vsub.s32 0, %v35_v3  ;;  %v40_v11 = vsub.s32 4, %v35_v3  ;;  %v30_v13 = vmul.f32 %v29_v5, %v27_v8  ;;  %v31_v14 = vmul.f32 %v29_v5, %v28_v9  ;;  %vm93_vm8 = vmor %vm210_vm5, %vm206_vm4  ;;  %s147_s23 = scalar_lea.vmem %s112_s1, 64  ;;  %p152_p9 = scmp.lt.s32.totalorder %s112_s1, %s112_s1 }
  0x17   :  { %v69_v15 = vsub.s32 %v66_v6, %v35_v3  ;;  %vm96_vm9 = vmand %vm94_vm6, %vm95_vm7  ;;  %p148_p8 = scmp.ne.s32.totalorder %s112_s1, %s147_s23  ;;  %p153_p10 = scmp.lt.s32.totalorder %s147_s23, %s147_s23 }
  0x18   :  { %v37_v16 = vrot.slane %v30_v13, %v36_v10  ;;  %v41_v17 = vrot.slane %v30_v13, %v40_v11  ;;  %v45_v18 = vrot.slane %v31_v14, %v36_v10  ;;  %v49_v19 = vrot.slane %v31_v14, %v40_v11  ;;  %vm97_vm12 = vmor %vm96_vm9, %vm93_vm8 }
  0x19   :  { %vm100_vm13 = vmand %vm98_vm10, %vm99_vm11  ;;  %p154_p11 = por %p153_p10, %p152_p9 }
  0x1a   :  { %v120_v20 = vpack.c.bf16 %v41_v17, %v37_v16  ;;  %v121_v21 = vpack.c.bf16 %v49_v19, %v45_v18  ;;  %vm101_vm14 = vmor %vm100_vm13, %vm97_vm12 }
  0x1b   :  { %p155_p12 = pnand %p154_p11, %p148_p8 }
  0x1c   :  { %v70_v22 = vrot.slane %v120_v20, %v69_v15  ;;  %v77_v23 = vrot.slane %v121_v21, %v69_v15 }
  0x1e   :  { %v78_v24 = vcombine.low %v70_v22, %v77_v23 }
  0x20   :  { %v85_v26 = vrot.slane %v78_v24, %v69_v15 }
  0x22   :  { %v103_v27 = vsel %vm101_vm14, %v85_v26, %v102_v25 }
  0x23   :  { %104 = vst [vmem:[#allocation6] sm:$0xf] %v103_v27 }
  0x24   :  { %158 = shalt.err (!%p155_p12)
}
  0x25   :  { %s159_s26 = scalar_lea.hbm %s232_s2, 64 }
  0x26   :  { %p160_p13 = scmp.ne.s32.totalorder %s232_s2, %s159_s26  ;;  %p163_p0 = scmp.lt.u32.totalorder %s159_s26, %s232_s2 }
  0x28   :  { %p165_p1 = pnand %p163_p0, %p160_p13 }
  0x2a   :  { %168 = shalt.err (!%p165_p1)
}
  0x2b   :  { %114 = dma.vmem_to_hbm [thread:$0]  %s112_s1, 64, %s232_s2, [#allocation5]  }
  0x2c   :  { %171 = dma.done.wait [#allocation5], 64  }
  0x2d   :  { %172 = vsyncadd [#allocation5], 4294967232 }
  0x2e   :  { %118 = vsyncpa [#allocation4], 1 }
  0x2f   :  { %119 = vsyncpa [#allocation5], 1 }

</bundles_post_ra>
